<compile_context>
chip_gen: v7x
topology: tpu7x:2x2x1
jax: 0.10.0
libtpu: 0.0.40
codegen_flags: <defaults>
</compile_context>

<pallas_src>
import math
import functools

import jax
import jax.numpy as jnp
from jax.experimental import pallas as pl
from jax.experimental.pallas import tpu as pltpu


def _round_up(a: int, b: int) -> int:
    return -(-a // b) * b


def _gcn_support_kernel(adj_ref, x_ref, wt_ref, wb_ref, b_ref, o_ref, supp_ref):
    """out = x @ W_top + (adj @ x) @ W_bot + bias    (used when F_out_p >= F_in_p).

    Grid = (row tiles i [parallel], reduction tiles k [arbitrary]).
      adj_ref : [tm, tk]          bf16  adjacency tile          (varies with i, k)
      x_ref   : [N_x_p, F_in_p]   bf16  full padded x, resident (constant index_map)
      wt_ref  : [F_in_p, F_out_p] bf16  top half of W, resident
      wb_ref  : [F_in_p, F_out_p] f32   bottom half of W, resident (f32 -> no acc rounding)
      b_ref   : [1, F_out_p]      f32   bias (zeros when absent), resident
      o_ref   : [tm, F_out_p]     f32   output tile             (varies with i)
      supp_ref: [tm, F_in_p]      f32   accumulator for adj @ x across k
    """
    i = pl.program_id(0)
    k = pl.program_id(1)
    tm, tk = adj_ref.shape

    @pl.when(k == 0)
    def _():
        supp_ref[...] = jnp.zeros_like(supp_ref)

    rk = pl.multiple_of(k * tk, 128)
    supp_ref[...] += jnp.dot(
        adj_ref[...], x_ref[pl.ds(rk, tk), :], preferred_element_type=jnp.float32
    )

    @pl.when(k == pl.num_programs(1) - 1)
    def _():
        ri = pl.multiple_of(i * tm, 128)
        xi = x_ref[pl.ds(ri, tm), :]
        out = jnp.dot(xi, wt_ref[...], preferred_element_type=jnp.float32)
        # support kept in f32 for this dot (no bf16 rounding of the accumulator).
        out += jnp.dot(supp_ref[...], wb_ref[...], preferred_element_type=jnp.float32)
        out += b_ref[...]
        o_ref[...] = out.astype(o_ref.dtype)


def _gcn_reassoc_kernel(adj_ref, y_ref, x_ref, wt_ref, b_ref, o_ref, acc_ref):
    """out = x @ W_top + adj @ (x @ W_bot) + bias    (used when F_out_p < F_in_p).

      adj_ref: [tm, tk]            bf16  adjacency tile
      y_ref  : [N_cols_p, F_out_p] bf16  precomputed x @ W_bot, resident
      x_ref  : [N_rows_p, F_in_p]  bf16  x for the epilogue term, resident
      wt_ref : [F_in_p, F_out_p]   bf16  top half of W, resident
      b_ref  : [1, F_out_p]        f32   bias, resident
      o_ref  : [tm, F_out_p]       f32   output tile
      acc_ref: [tm, F_out_p]       f32   output-width accumulator
    """
    i = pl.program_id(0)
    k = pl.program_id(1)
    tm, tk = adj_ref.shape

    @pl.when(k == 0)
    def _():
        # x @ W_top (+ bias) hoisted to k == 0 so the k == last tail is just a store.
        ri = pl.multiple_of(i * tm, 128)
        xi = x_ref[pl.ds(ri, tm), :]
        acc_ref[...] = (
            jnp.dot(xi, wt_ref[...], preferred_element_type=jnp.float32) + b_ref[...]
        )

    rk = pl.multiple_of(k * tk, 128)
    acc_ref[...] += jnp.dot(
        adj_ref[...], y_ref[pl.ds(rk, tk), :], preferred_element_type=jnp.float32
    )

    @pl.when(k == pl.num_programs(1) - 1)
    def _():
        o_ref[...] = acc_ref[...].astype(o_ref.dtype)


@functools.partial(jax.jit, static_argnames=("compute_dtype", "tm", "tk"))
def graph_convolution(x, adj, weight, bias=None, *, compute_dtype=jnp.bfloat16,
                      tm=None, tk=None):
    """GCN layer forward: cat([x, adj@x], dim=1) @ weight (+ bias).

    x      : [N, F_in]       float32
    adj    : [N, N]          float32 (normalized adjacency, dense)
    weight : [2*F_in, F_out] float32
    bias   : optional [F_out] float32
    """
    n, f_in = x.shape
    f_out = weight.shape[1]
    assert adj.shape == (n, n)
    assert weight.shape == (2 * f_in, f_out)

    f_in_p = _round_up(f_in, 128)
    f_out_p = _round_up(f_out, 128)
    # Reassociate out = x@W_top + adj@(x@W_bot) when it narrows the k-streamed RHS.
    reassociate = f_out_p < f_in_p
    stream_w = f_out_p if reassociate else f_in_p

    # ---- tile selection: large tiles, capped by the 128-rounded N so adjacency padding
    # stays close to N; keep >= 2 row tiles when possible (v7x megacore split). ----
    n_128 = _round_up(n, 128)
    tk_sel = _round_up(tk, 128) if tk is not None else min(2048, n_128)
    if tm is not None:
        tm_sel = _round_up(tm, 128)
    elif n_128 <= 256:
        tm_sel = n_128
    else:
        tm_sel = min(1024, _round_up(max(n_128 // 2, 128), 128))

    def vmem_footprint(tm_, tk_):
        rows_p = _round_up(n, tm_)
        cols_p = _round_up(n, tk_)
        byt = 2 * tm_ * tk_ * 2              # adj tiles, double-buffered bf16
        byt += 2 * tm_ * f_out_p * 4         # output tiles, double-buffered f32
        byt += 2 * f_out_p * 4               # bias
        byt += tm_ * stream_w * 4            # f32 accumulator scratch
        byt += 2 * f_in_p * f_out_p * 2      # W_top (bf16, resident)
        if reassociate:
            byt += 2 * rows_p * f_in_p * 2       # resident x (epilogue term)
            byt += 2 * cols_p * f_out_p * 2      # resident y = x @ W_bot
        else:
            byt += 2 * max(rows_p, cols_p) * f_in_p * 2   # resident x
            byt += 2 * f_in_p * f_out_p * 4               # W_bot (f32, resident)
        return byt

    budget = 40 * 1024 * 1024   # headroom inside the 48 MiB limit (v7x: 64 MiB physical)
    while vmem_footprint(tm_sel, tk_sel) > budget:
        if tk_sel >= tm_sel and tk_sel > 128:
            tk_sel = max(128, _round_up(tk_sel // 2, 128))
        elif tm_sel > 128:
            tm_sel = max(128, _round_up(tm_sel // 2, 128))
        else:
            break   # TODO(synk): stream x instead of keeping it resident in this regime

    n_rows_p = _round_up(n, tm_sel)
    n_cols_p = _round_up(n, tk_sel)
    grid = (n_rows_p // tm_sel, n_cols_p // tk_sel)

    def pad2(a, rows, cols, dtype):
        r, c = a.shape
        if (r, c) != (rows, cols):
            a = jnp.pad(a, ((0, rows - r), (0, cols - c)))
        return a.astype(dtype)

    w_top = weight[:f_in, :]
    w_bot = weight[f_in:, :]

    adj_p = pad2(adj, n_rows_p, n_cols_p, compute_dtype)
    wt_p = pad2(w_top, f_in_p, f_out_p, compute_dtype)
    if bias is None:
        b_p = jnp.zeros((1, f_out_p), jnp.float32)
    else:
        b_p = pad2(bias.reshape(1, f_out), 1, f_out_p, jnp.float32)

    compiler_params = pltpu.CompilerParams(
        dimension_semantics=("parallel", "arbitrary"),
        vmem_limit_bytes=48 * 1024 * 1024,
    )

    def resident(shape):
        # Constant index_map -> single DMA, block stays resident across the whole grid.
        return pl.BlockSpec(shape, lambda i, k: (0, 0))

    if reassociate:
        x_p = pad2(x, n_rows_p, f_in_p, compute_dtype)
        y_p = pad2(x @ w_bot, n_cols_p, f_out_p, compute_dtype)   # f32 matmul, then bf16
        out_p = pl.pallas_call(
            _gcn_reassoc_kernel,
            out_shape=jax.ShapeDtypeStruct((n_rows_p, f_out_p), jnp.float32),
            grid_spec=pltpu.PrefetchScalarGridSpec(
                num_scalar_prefetch=0,
                grid=grid,
                in_specs=[
                    pl.BlockSpec((tm_sel, tk_sel), lambda i, k: (i, k)),   # adj tile
                    resident((n_cols_p, f_out_p)),                         # y = x @ W_bot
                    resident((n_rows_p, f_in_p)),                          # x (epilogue)
                    resident((f_in_p, f_out_p)),                           # W_top
                    resident((1, f_out_p)),                                # bias
                ],
                out_specs=pl.BlockSpec((tm_sel, f_out_p), lambda i, k: (i, 0)),
                scratch_shapes=[pltpu.VMEM((tm_sel, f_out_p), jnp.float32)],
            ),
            compiler_params=compiler_params,
        )(adj_p, y_p, x_p, wt_p, b_p)
    else:
        n_x_p = max(n_rows_p, n_cols_p)
        x_p = pad2(x, n_x_p, f_in_p, compute_dtype)
        wb_p = pad2(w_bot, f_in_p, f_out_p, jnp.float32)
        out_p = pl.pallas_call(
            _gcn_support_kernel,
            out_shape=jax.ShapeDtypeStruct((n_rows_p, f_out_p), jnp.float32),
            grid_spec=pltpu.PrefetchScalarGridSpec(
                num_scalar_prefetch=0,
                grid=grid,
                in_specs=[
                    pl.BlockSpec((tm_sel, tk_sel), lambda i, k: (i, k)),   # adj tile
                    resident((n_x_p, f_in_p)),                             # x, resident
                    resident((f_in_p, f_out_p)),                           # W_top (bf16)
                    resident((f_in_p, f_out_p)),                           # W_bot (f32)
                    resident((1, f_out_p)),                                # bias
                ],
                out_specs=pl.BlockSpec((tm_sel, f_out_p), lambda i, k: (i, 0)),
                scratch_shapes=[pltpu.VMEM((tm_sel, f_in_p), jnp.float32)],
            ),
            compiler_params=compiler_params,
        )(adj_p, x_p, wt_p, wb_p, b_p)

    return out_p[:n, :f_out]


def _reference(x, adj, weight, bias=None):
    support = adj @ x
    out = jnp.concatenate([x, support], axis=1) @ weight
    if bias is not None:
        out = out + bias
    return out


def _make_inputs(key, n, f_in, f_out, with_bias=False):
    kx, ka, kw, kb = jax.random.split(key, 4)
    x = jax.random.normal(kx, (n, f_in), dtype=jnp.float32)
    # Symmetric row-normalized adjacency (dense), deterministic.
    a_raw = (jax.random.uniform(ka, (n, n)) > 0.5).astype(jnp.float32)
    a_sym = jnp.maximum(a_raw, a_raw.T) + jnp.eye(n, dtype=jnp.float32)
    adj = a_sym / jnp.sum(a_sym, axis=1, keepdims=True)
    # Parameter init mirroring reset_parameters(): uniform(-stdv, stdv), stdv = 1/sqrt(F_out).
    stdv = 1.0 / math.sqrt(f_out)
    weight = jax.random.uniform(
        kw, (2 * f_in, f_out), dtype=jnp.float32, minval=-stdv, maxval=stdv
    )
    bias = None
    if with_bias:
        bias = jax.random.uniform(
            kb, (f_out,), dtype=jnp.float32, minval=-stdv, maxval=stdv
        )
    return x, adj, weight, bias


def _check(name, out, ref, atol=5e-2, rtol=5e-2):
    ok = bool(jnp.allclose(out, ref, atol=atol, rtol=rtol))
    assert ok, f"{name}: mismatch vs reference"


if __name__ == "__main__":
    key = jax.random.PRNGKey(0)
    k1, k2, k3 = jax.random.split(key, 3)

    # 1) Small single-tile case consistent with the module: 8 nodes, 16 -> 32 features.
    x, adj, w, _ = _make_inputs(k1, 8, 16, 32)
    out = jax.block_until_ready(graph_convolution(x, adj, w))
    _check("small", out, _reference(x, adj, w))

    # 2) Multi-row-tile case with default (N-capped, large) tiles: grid = (2, 1).
    x2, adj2, w2, b2 = _make_inputs(k2, 640, 16, 32, with_bias=True)
    out2 = jax.block_until_ready(graph_convolution(x2, adj2, w2, b2))
    _check("640-default", out2, _reference(x2, adj2, w2, b2))

    # 3) Same problem, forced small tiles to exercise k-axis accumulation: grid = (3, 3).
    out3 = jax.block_until_ready(graph_convolution(x2, adj2, w2, b2, tm=256, tk=256))
    _check("640-tiled", out3, _reference(x2, adj2, w2, b2))

    # 4) Reassociated path (F_in_p > F_out_p) with multi-k accumulation: grid = (3, 3).
    x4, adj4, w4, _ = _make_inputs(k3, 320, 300, 32)
    out4 = jax.block_until_ready(graph_convolution(x4, adj4, w4, tm=128, tk=128))
    _check("reassoc", out4, _reference(x4, adj4, w4))

    print("KERNEL_OK")
</pallas_src>

<mosaic_0001>
module attributes {stable_mosaic.version = 11 : i64} {
  func.func @_gcn_support_kernel(%arg0: i32, %arg1: i32, %arg2: memref<128x128xbf16, #tpu.memory_space<vmem>>, %arg3: memref<128x128xbf16, #tpu.memory_space<vmem>>, %arg4: memref<128x128xbf16, #tpu.memory_space<vmem>>, %arg5: memref<128x128xf32, #tpu.memory_space<vmem>>, %arg6: memref<1x128xf32, #tpu.memory_space<vmem>>, %arg7: memref<128x128xf32, #tpu.memory_space<vmem>>, %arg8: memref<128x128xf32, #tpu.memory_space<vmem>>) attributes {dimension_semantics = [#tpu.dimension_semantics<parallel>, #tpu.dimension_semantics<arbitrary>], iteration_bounds = array<i64: 1, 1>, scalar_prefetch = 0 : i64, scratch_operands = 1 : i64, tpu.core_type = #tpu.core_type<tc>, window_params = [{transform_indices = @transform_0, window_bounds = array<i64: 128, 128>}, {pipeline_mode = #tpu.pipeline_mode<synchronous>, transform_indices = @transform_1, window_bounds = array<i64: 128, 128>}, {pipeline_mode = #tpu.pipeline_mode<synchronous>, transform_indices = @transform_2, window_bounds = array<i64: 128, 128>}, {pipeline_mode = #tpu.pipeline_mode<synchronous>, transform_indices = @transform_3, window_bounds = array<i64: 128, 128>}, {pipeline_mode = #tpu.pipeline_mode<synchronous>, transform_indices = @transform_4, window_bounds = array<i64: 1, 128>}, {transform_indices = @transform_5, window_bounds = array<i64: 128, 128>}]} {
    %c0_i32 = arith.constant 0 : i32
    %0 = arith.cmpi eq, %arg1, %c0_i32 : i32
    %1 = arith.extui %0 : i1 to i32
    %c0_i32_0 = arith.constant 0 : i32
    %2 = arith.cmpi ne, %1, %c0_i32_0 : i32
    scf.if %2 {
      %cst_9 = arith.constant 0.000000e+00 : f32
      %15 = vector.broadcast %cst_9 : f32 to vector<128x128xf32>
      %c0_10 = arith.constant 0 : index
      %c0_11 = arith.constant 0 : index
      %16 = vector.load %arg8[%c0_10, %c0_11] : memref<128x128xf32, #tpu.memory_space<vmem>>, vector<128x128xf32>
      tpu.vector_store %arg8[%c0_10, %c0_11], %15 {strides = array<i32>} : memref<128x128xf32, #tpu.memory_space<vmem>>, vector<128x128xf32>,
    } else {
    }
    %c128_i32 = arith.constant 128 : i32
    %3 = arith.muli %arg1, %c128_i32 : i32
    %4 = tpu.assume_multiple %3, 128 : i32
    %c0 = arith.constant 0 : index
    %c0_1 = arith.constant 0 : index
    %5 = vector.load %arg8[%c0, %c0_1] : memref<128x128xf32, #tpu.memory_space<vmem>>, vector<128x128xf32>
    %c0_2 = arith.constant 0 : index
    %c0_3 = arith.constant 0 : index
    %6 = vector.load %arg2[%c0_2, %c0_3] : memref<128x128xbf16, #tpu.memory_space<vmem>>, vector<128x128xbf16>
    %7 = arith.index_cast %4 : i32 to index
    %c0_4 = arith.constant 0 : index
    %8 = vector.load %arg3[%7, %c0_4] : memref<128x128xbf16, #tpu.memory_space<vmem>>, vector<128x128xbf16>
    %cst = arith.constant dense<0.000000e+00> : vector<128x128xf32>
    %9 = tpu.matmul %6, %8, %cst {dimension_numbers = #tpu.dot_dimension_numbers<[1], [0], [0], [1], [0, 0, 1, 1], [], []>} : vector<128x128xbf16>, vector<128x128xbf16>, vector<128x128xf32> -> vector<128x128xf32>
    %10 = arith.addf %5, %9 : vector<128x128xf32>
    %c0_5 = arith.constant 0 : index
    %c0_6 = arith.constant 0 : index
    %11 = vector.load %arg8[%c0_5, %c0_6] : memref<128x128xf32, #tpu.memory_space<vmem>>, vector<128x128xf32>
    tpu.vector_store %arg8[%c0_5, %c0_6], %10 {strides = array<i32>} : memref<128x128xf32, #tpu.memory_space<vmem>>, vector<128x128xf32>,
    %c0_i32_7 = arith.constant 0 : i32
    %12 = arith.cmpi eq, %arg1, %c0_i32_7 : i32
    %13 = arith.extui %12 : i1 to i32
    %c0_i32_8 = arith.constant 0 : i32
    %14 = arith.cmpi ne, %13, %c0_i32_8 : i32
    scf.if %14 {
      %c128_i32_9 = arith.constant 128 : i32
      %15 = arith.muli %arg0, %c128_i32_9 : i32
      %16 = tpu.assume_multiple %15, 128 : i32
      %17 = arith.index_cast %16 : i32 to index
      %c0_10 = arith.constant 0 : index
      %18 = vector.load %arg3[%17, %c0_10] : memref<128x128xbf16, #tpu.memory_space<vmem>>, vector<128x128xbf16>
      %c0_11 = arith.constant 0 : index
      %c0_12 = arith.constant 0 : index
      %19 = vector.load %arg4[%c0_11, %c0_12] : memref<128x128xbf16, #tpu.memory_space<vmem>>, vector<128x128xbf16>
      %cst_13 = arith.constant dense<0.000000e+00> : vector<128x128xf32>
      %20 = tpu.matmul %18, %19, %cst_13 {dimension_numbers = #tpu.dot_dimension_numbers<[1], [0], [0], [1], [0, 0, 1, 1], [], []>} : vector<128x128xbf16>, vector<128x128xbf16>, vector<128x128xf32> -> vector<128x128xf32>
      %c0_14 = arith.constant 0 : index
      %c0_15 = arith.constant 0 : index
      %21 = vector.load %arg8[%c0_14, %c0_15] : memref<128x128xf32, #tpu.memory_space<vmem>>, vector<128x128xf32>
      %c0_16 = arith.constant 0 : index
      %c0_17 = arith.constant 0 : index
      %22 = vector.load %arg5[%c0_16, %c0_17] : memref<128x128xf32, #tpu.memory_space<vmem>>, vector<128x128xf32>
      %cst_18 = arith.constant dense<0.000000e+00> : vector<128x128xf32>
      %23 = tpu.matmul %21, %22, %cst_18 {dimension_numbers = #tpu.dot_dimension_numbers<[1], [0], [0], [1], [0, 0, 1, 1], [], []>} : vector<128x128xf32>, vector<128x128xf32>, vector<128x128xf32> -> vector<128x128xf32>
      %24 = arith.addf %20, %23 : vector<128x128xf32>
      %c0_19 = arith.constant 0 : index
      %c0_20 = arith.constant 0 : index
      %25 = vector.load %arg6[%c0_19, %c0_20] : memref<1x128xf32, #tpu.memory_space<vmem>>, vector<1x128xf32>
      %26 = vector.broadcast %25 : vector<1x128xf32> to vector<128x128xf32>
      %27 = arith.addf %24, %26 : vector<128x128xf32>
      %c0_21 = arith.constant 0 : index
      %c0_22 = arith.constant 0 : index
      %28 = vector.load %arg7[%c0_21, %c0_22] : memref<128x128xf32, #tpu.memory_space<vmem>>, vector<128x128xf32>
      tpu.vector_store %arg7[%c0_21, %c0_22], %27 {strides = array<i32>} : memref<128x128xf32, #tpu.memory_space<vmem>>, vector<128x128xf32>,
    } else {
    }
    return
  }
  func.func @transform_0(%arg0: i32, %arg1: i32) -> (i32, i32) {
    %c0_i32 = arith.constant 0 : i32
    return %arg0, %arg1 : i32, i32
  }
  func.func @transform_1(%arg0: i32, %arg1: i32) -> (i32, i32) {
    %c0_i32 = arith.constant 0 : i32
    %c0_i32_0 = arith.constant 0 : i32
    %c0_i32_1 = arith.constant 0 : i32
    return %c0_i32, %c0_i32_0 : i32, i32
  }
  func.func @transform_2(%arg0: i32, %arg1: i32) -> (i32, i32) {
    %c0_i32 = arith.constant 0 : i32
    %c0_i32_0 = arith.constant 0 : i32
    %c0_i32_1 = arith.constant 0 : i32
    return %c0_i32, %c0_i32_0 : i32, i32
  }
  func.func @transform_3(%arg0: i32, %arg1: i32) -> (i32, i32) {
    %c0_i32 = arith.constant 0 : i32
    %c0_i32_0 = arith.constant 0 : i32
    %c0_i32_1 = arith.constant 0 : i32
    return %c0_i32, %c0_i32_0 : i32, i32
  }
  func.func @transform_4(%arg0: i32, %arg1: i32) -> (i32, i32) {
    %c0_i32 = arith.constant 0 : i32
    %c0_i32_0 = arith.constant 0 : i32
    %c0_i32_1 = arith.constant 0 : i32
    return %c0_i32, %c0_i32_0 : i32, i32
  }
  func.func @transform_5(%arg0: i32, %arg1: i32) -> (i32, i32) {
    %c0_i32 = arith.constant 0 : i32
    %c0_i32_0 = arith.constant 0 : i32
    return %arg0, %c0_i32 : i32, i32
  }
}

</mosaic_0001>

<bundles_post_ra>
// kernel: graph_convolution.1
= control target key start
LH: loop header
LB: loop body
LE: loop exit
PB: predicated region body
PF: predicated region fallthrough
CT: control target
= control target key end

     0   :  { %s1334_s1 = inlined_call_operand.vmem [shape: bf16[128,128], index: 1, kind: input, shape index: {}]   ;;  %s1335_s0 = inlined_call_operand.vmem [shape: bf16[128,128], index: 0, kind: input, shape index: {}]   ;;  %s1336_s3 = inlined_call_operand.vmem [shape: f32[128,128], index: 3, kind: input, shape index: {}]   ;;  %s1337_s2 = inlined_call_operand.vmem [shape: bf16[128,128], index: 2, kind: input, shape index: {}]   ;;  %s1338_s4 = inlined_call_operand.vmem [shape: f32[1,128], index: 4, kind: input, shape index: {}]   ;;  %s1339_s5 = inlined_call_operand.vmem [shape: f32[128,128], index: 5, kind: output, shape index: {}]  }
   0x1   :  { %v1041_v0 = vld [vmem:[%s1334_s1] sm:$0xff]   ;;  %v1042_v1 = vld [vmem:[%s1334_s1 + $0x8] sm:$0xff]   ;;  %v1043_v2 = vld [vmem:[%s1334_s1 + $0x10] sm:$0xff]  }
   0x2   :  { %873 = vmatprep.subr.bf16.mxu0 %v1041_v0  ;;  %v1044_v3 = vld [vmem:[%s1334_s1 + $0x18] sm:$0xff]   ;;  %v1049_v4 = vld [vmem:[%s1335_s0] sm:$0xff]   ;;  %v1046_v6 = vld [vmem:[%s1334_s1 + $0x28] sm:$0xff]  }
   0x3   :  { %874 = vmatpush3.bf16.msra.mxu0 %v1041_v0  ;;  %889 = vmatprep.mubr.bf16.mxu0 %v1049_v4  ;;  %v1045_v5 = vld [vmem:[%s1334_s1 + $0x20] sm:$0xff]   ;;  %v376_v8 = vld [vmem:[%s1336_s3 + $0x8] sm:$0xff]  ;;  %v377_v10 = vld [vmem:[%s1336_s3 + $0x10] sm:$0xff] }
   0x4   :  { %875 = vmatprep.subr.bf16.mxu0 %v1042_v1  ;;  %v375_v7 = vld [vmem:[%s1336_s3] sm:$0xff]  ;;  %v378_v11 = vld [vmem:[%s1336_s3 + $0x18] sm:$0xff]  ;;  %v1047_v12 = vld [vmem:[%s1334_s1 + $0x30] sm:$0xff]  }
   0x5   :  { %v993_v9 = vpack.c.bf16 %v376_v8, %v375_v7  ;;  %v997_v13 = vpack.c.bf16 %v378_v11, %v377_v10  ;;  %v379_v14 = vld [vmem:[%s1336_s3 + $0x20] sm:$0xff]  ;;  %v380_v15 = vld [vmem:[%s1336_s3 + $0x28] sm:$0xff]  ;;  %v381_v17 = vld [vmem:[%s1336_s3 + $0x30] sm:$0xff] }
   0x6   :  { %v1001_v16 = vpack.c.bf16 %v380_v15, %v379_v14  ;;  %v382_v18 = vld [vmem:[%s1336_s3 + $0x38] sm:$0xff]  ;;  %v383_v21 = vld [vmem:[%s1336_s3 + $0x40] sm:$0xff]  ;;  %v384_v22 = vld [vmem:[%s1336_s3 + $0x48] sm:$0xff] }
   0x7   :  { %876 = vmatpush3.bf16.msra.mxu0 %v1042_v1  ;;  %994 = vmatprep.subr.bf16.mxu1 %v993_v9  ;;  %v1048_v19 = vld [vmem:[%s1334_s1 + $0x38] sm:$0xff]   ;;  %v1005_v20 = vpack.c.bf16 %v382_v18, %v381_v17  ;;  %v1050_v23 = vld [vmem:[%s1335_s0 + $0x8] sm:$0xff]   ;;  %v1166_v24 = vld [vmem:[%s1337_s2] sm:$0xff]   ;;  %v1009_v29 = vpack.c.bf16 %v384_v22, %v383_v21 }
   0x8   :  { %877 = vmatprep.subr.bf16.mxu0 %v1043_v2  ;;  %996 = vmatpush3.bf16.msra.mxu1 %v993_v9  ;;  %v1051_v25 = vld [vmem:[%s1335_s0 + $0x10] sm:$0xff]   ;;  %v386_v27 = vld [vmem:[%s1336_s3 + $0x58] sm:$0xff]  ;;  %v1180_v28 = vld [vmem:[%s1337_s2 + $0x8] sm:$0xff]  }
   0x9   :  { %998 = vmatprep.subr.bf16.mxu1 %v997_v13  ;;  %v385_v26 = vld [vmem:[%s1336_s3 + $0x50] sm:$0xff]  ;;  %v387_v31 = vld [vmem:[%s1336_s3 + $0x60] sm:$0xff]  ;;  %v388_v32 = vld [vmem:[%s1336_s3 + $0x68] sm:$0xff] }
   0xa   :  { %v1013_v30 = vpack.c.bf16 %v386_v27, %v385_v26  ;;  %v1194_v33 = vld [vmem:[%s1337_s2 + $0x10] sm:$0xff]   ;;  %v1052_v34 = vld [vmem:[%s1335_s0 + $0x18] sm:$0xff]   ;;  %v1017_v35 = vpack.c.bf16 %v388_v32, %v387_v31  ;;  %v1053_v36 = vld [vmem:[%s1335_s0 + $0x20] sm:$0xff]  }
   0xb   :  { %878 = vmatpush3.bf16.msra.mxu0 %v1043_v2  ;;  %v389_v37 = vld [vmem:[%s1336_s3 + $0x70] sm:$0xff]  ;;  %v390_v38 = vld [vmem:[%s1336_s3 + $0x78] sm:$0xff]  ;;  %v1061_v41 = vld [vmem:[%s1337_s2 + $0x20] sm:$0xff]  }
   0xc   :  { %879 = vmatprep.subr.bf16.mxu0 %v1044_v3  ;;  %1000 = vmatpush3.bf16.msra.mxu1 %v997_v13  ;;  %v1060_v39 = vld [vmem:[%s1337_s2 + $0x18] sm:$0xff]   ;;  %v1021_v40 = vpack.c.bf16 %v390_v38, %v389_v37  ;;  %v1054_v42 = vld [vmem:[%s1335_s0 + $0x28] sm:$0xff]   ;;  %v1055_v43 = vld [vmem:[%s1335_s0 + $0x30] sm:$0xff]  }
   0xd   :  { %1002 = vmatprep.subr.bf16.mxu1 %v1001_v16  ;;  %v1062_v44 = vld [vmem:[%s1337_s2 + $0x28] sm:$0xff]   ;;  %v1063_v45 = vld [vmem:[%s1337_s2 + $0x30] sm:$0xff]   ;;  %v1056_v46 = vld [vmem:[%s1335_s0 + $0x38] sm:$0xff]  }
   0xe   :  { %v1064_v47 = vld [vmem:[%s1337_s2 + $0x38] sm:$0xff]   ;;  %v1065_v48 = vld [vmem:[%s1334_s1] sm:$0xff]   ;;  %v1066_v49 = vld [vmem:[%s1334_s1 + $0x8] sm:$0xff]  }
   0xf   :  { %880 = vmatpush3.bf16.msra.mxu0 %v1044_v3  ;;  %v1067_v50 = vld [vmem:[%s1334_s1 + $0x10] sm:$0xff]   ;;  %v1068_v51 = vld [vmem:[%s1334_s1 + $0x18] sm:$0xff]   ;;  %v1069_v4 = vld [vmem:[%s1334_s1 + $0x20] sm:$0xff]  }
  0x10   :  { %881 = vmatprep.subr.bf16.mxu0 %v1045_v5  ;;  %1004 = vmatpush3.bf16.msra.mxu1 %v1001_v16  ;;  %v1072_v7 = vld [vmem:[%s1334_s1 + $0x38] sm:$0xff]   ;;  %v1268_v17 = vld [vmem:[%s1338_s4] ss:$0 sm:$0xff] }
  0x11   :  { %1006 = vmatprep.subr.bf16.mxu1 %v1005_v20 }
  0x13   :  { %882 = vmatpush3.bf16.msra.mxu0 %v1045_v5  ;;  %v1070_v5 = vld [vmem:[%s1334_s1 + $0x28] sm:$0xff]  }
  0x14   :  { %883 = vmatprep.subr.bf16.mxu0 %v1046_v6  ;;  %1008 = vmatpush3.bf16.msra.mxu1 %v1005_v20 }
  0x15   :  { %1010 = vmatprep.subr.bf16.mxu1 %v1009_v29 }
  0x17   :  { %884 = vmatpush3.bf16.msra.mxu0 %v1046_v6  ;;  %v1071_v6 = vld [vmem:[%s1334_s1 + $0x30] sm:$0xff]  }
  0x18   :  { %885 = vmatprep.subr.bf16.mxu0 %v1047_v12  ;;  %1012 = vmatpush3.bf16.msra.mxu1 %v1009_v29 }
  0x19   :  { %1014 = vmatprep.subr.bf16.mxu1 %v1013_v30 }
  0x1b   :  { %886 = vmatpush3.bf16.msra.mxu0 %v1047_v12 }
  0x1c   :  { %887 = vmatprep.subr.bf16.mxu0 %v1048_v19  ;;  %1016 = vmatpush3.bf16.msra.mxu1 %v1013_v30 }
  0x1d   :  { %1018 = vmatprep.subr.bf16.mxu1 %v1017_v35 }
  0x1f   :  { %888 = vmatpush3.bf16.msra.mxu0 %v1048_v19 }
  0x20   :  { %961 = vmatprep.subr.bf16.mxu0 %v1166_v24  ;;  %1020 = vmatpush3.bf16.msra.mxu1 %v1017_v35 }
  0x21   :  { %1022 = vmatprep.subr.bf16.mxu1 %v1021_v40 }
  0x22   :  { %890 = vmatmul.mubr.bf16.vlgmr.msra.gmra.mrb[0].mxu0 %v1050_v23 }
  0x23   :  { %893 = vmatprep.mubr.bf16.mxu0 %v1051_v25  ;;  %962 = vmatpush3.bf16.msra.mxu0 %v1166_v24 }
  0x24   :  { %963 = vmatprep.subr.bf16.mxu0 %v1180_v28  ;;  %1024 = vmatpush3.bf16.msra.mxu1 %v1021_v40 }
  0x25   :  { %1025 = vmatprep.subr.bf16.mxu1 %v1166_v24 }
  0x27   :  { %964 = vmatpush3.bf16.msra.mxu0 %v1180_v28 }
  0x28   :  { %965 = vmatprep.subr.bf16.mxu0 %v1194_v33 }
  0x2a   :  { %894 = vmatmul.mubr.bf16.gmra.mrb[4].mxu0 %v1052_v34 }
  0x2b   :  { %897 = vmatprep.mubr.bf16.mxu0 %v1053_v36  ;;  %966 = vmatpush3.bf16.msra.mxu0 %v1194_v33 }
  0x2c   :  { %967 = vmatprep.subr.bf16.mxu0 %v1060_v39 }
  0x2f   :  { %968 = vmatpush3.bf16.msra.mxu0 %v1060_v39 }
  0x30   :  { %969 = vmatprep.subr.bf16.mxu0 %v1061_v41 }
  0x32   :  { %898 = vmatmul.mubr.bf16.gmra.mrb[8].mxu0 %v1054_v42 }
  0x33   :  { %901 = vmatprep.mubr.bf16.mxu0 %v1055_v43  ;;  %970 = vmatpush3.bf16.msra.mxu0 %v1061_v41 }
  0x34   :  { %971 = vmatprep.subr.bf16.mxu0 %v1062_v44 }
  0x37   :  { %972 = vmatpush3.bf16.msra.mxu0 %v1062_v44 }
  0x38   :  { %973 = vmatprep.subr.bf16.mxu0 %v1063_v45 }
  0x3a   :  { %902 = vmatmul.mubr.bf16.gmra.mrb[12].mxu0 %v1056_v46 }
  0x3b   :  { %974 = vmatpush3.bf16.msra.mxu0 %v1063_v45  ;;  %977 = vmatprep.mubr.bf16.mxu0 %v1065_v48 }
  0x3c   :  { %975 = vmatprep.subr.bf16.mxu0 %v1064_v47 }
  0x3f   :  { %976 = vmatpush3.bf16.msra.mxu0 %v1064_v47 }
  0x42   :  { %978 = vmatmul.mubr.bf16.vlgmr.msra.gmra.mrb[16].mxu0 %v1066_v49 }
  0x43   :  { %981 = vmatprep.mubr.bf16.mxu0 %v1067_v50 }
  0x4a   :  { %982 = vmatmul.mubr.bf16.gmra.mrb[20].mxu0 %v1068_v51 }
  0xf5   :  { %v891_v52 = vpop.f32.mrb[0].mxu0 }
  0xf6   :  { %v224_v53 = vpop.f32.mrb[1].mxu0 }
  0xf7   :  { %v892_v54 = vpop.f32.mrb[2].mxu0  ;;  %937 = vmatprep.mubr.f32.mxu1 %v224_v53 }
  0xf8   :  { %v227_v55 = vpop.f32.mrb[3].mxu0 }
  0xf9   :  { %938 = vmatmul.mubr.f32.vlgmr.msra.gmra.mrb[0].mxu1 %v227_v55 }
  0xfa   :  { %1033 = vmatpush3.bf16.msra.mxu1 %v1166_v24  ;;  %940 = vmatprep.mubr.f32.mxu1 %v891_v52 }
  0xfb   :  { %1026 = vmatprep.subr.bf16.mxu1 %v1180_v28 }
  0xfd   :  { %v895_v56 = vpop.f32.mrb[4].mxu0  ;;  %941 = vmatmul.mubr.f32.gmra.mrb[2].mxu1 %v892_v54 }
  0xfe   :  { %1034 = vmatpush3.bf16.msra.mxu1 %v1180_v28  ;;  %v240_v57 = vpop.f32.mrb[5].mxu0 }
  0xff   :  { %v896_v58 = vpop.f32.mrb[6].mxu0  ;;  %943 = vmatprep.mubr.f32.mxu1 %v240_v57  ;;  %1027 = vmatprep.subr.bf16.mxu1 %v1194_v33 }
 0x100   :  { %v243_v59 = vpop.f32.mrb[7].mxu0 }
 0x101   :  { %944 = vmatmul.mubr.f32.gmra.mrb[4].mxu1 %v243_v59 }
 0x102   :  { %1035 = vmatpush3.bf16.msra.mxu1 %v1194_v33  ;;  %946 = vmatprep.mubr.f32.mxu1 %v895_v56 }
 0x103   :  { %1028 = vmatprep.subr.bf16.mxu1 %v1060_v39 }
 0x105   :  { %v899_v60 = vpop.f32.mrb[8].mxu0  ;;  %947 = vmatmul.mubr.f32.gmra.mrb[6].mxu1 %v896_v58 }
 0x106   :  { %1036 = vmatpush3.bf16.msra.mxu1 %v1060_v39  ;;  %v256_v61 = vpop.f32.mrb[9].mxu0 }
 0x107   :  { %v900_v62 = vpop.f32.mrb[10].mxu0  ;;  %949 = vmatprep.mubr.f32.mxu1 %v256_v61  ;;  %1029 = vmatprep.subr.bf16.mxu1 %v1061_v41 }
 0x108   :  { %v259_v63 = vpop.f32.mrb[11].mxu0 }
 0x109   :  { %950 = vmatmul.mubr.f32.gmra.mrb[8].mxu1 %v259_v63 }
 0x10a   :  { %1037 = vmatpush3.bf16.msra.mxu1 %v1061_v41  ;;  %952 = vmatprep.mubr.f32.mxu1 %v899_v60 }
 0x10b   :  { %1030 = vmatprep.subr.bf16.mxu1 %v1062_v44 }
 0x10d   :  { %v903_v0 = vpop.f32.mrb[12].mxu0  ;;  %953 = vmatmul.mubr.f32.gmra.mrb[10].mxu1 %v900_v62 }
 0x10e   :  { %1038 = vmatpush3.bf16.msra.mxu1 %v1062_v44  ;;  %v272_v1 = vpop.f32.mrb[13].mxu0 }
 0x10f   :  { %v904_v2 = vpop.f32.mrb[14].mxu0  ;;  %955 = vmatprep.mubr.f32.mxu1 %v272_v1  ;;  %1031 = vmatprep.subr.bf16.mxu1 %v1063_v45 }
 0x110   :  { %v275_v3 = vpop.f32.mrb[15].mxu0 }
 0x111   :  { %956 = vmatmul.mubr.f32.gmra.mrb[12].mxu1 %v275_v3 }
 0x112   :  { %1039 = vmatpush3.bf16.msra.mxu1 %v1063_v45  ;;  %958 = vmatprep.mubr.f32.mxu1 %v903_v0 }
 0x113   :  { %1032 = vmatprep.subr.bf16.mxu1 %v1064_v47 }
 0x115   :  { %959 = vmatmul.mubr.f32.gmra.mrb[14].mxu1 %v904_v2  ;;  %v979_v8 = vpop.f32.mrb[16].mxu0 }
 0x116   :  { %1040 = vmatpush3.bf16.msra.mxu1 %v1064_v47  ;;  %985 = vmatprep.mubr.bf16.mxu1 %v1069_v4  ;;  %v666_v9 = vpop.f32.mrb[17].mxu0 }
 0x117   :  { %v980_v10 = vpop.f32.mrb[18].mxu0 }
 0x118   :  { %v669_v11 = vpop.f32.mrb[19].mxu0 }
 0x119   :  { %986 = vmatmul.mubr.bf16.vlgmr.msra.gmra.mrb[16].mxu1 %v1070_v5 }
 0x11a   :  { %989 = vmatprep.mubr.bf16.mxu1 %v1071_v6 }
 0x11d   :  { %v983_v12 = vpop.f32.mrb[20].mxu0 }
 0x11e   :  { %v682_v13 = vpop.f32.mrb[21].mxu0 }
 0x11f   :  { %v984_v14 = vpop.f32.mrb[22].mxu0 }
 0x120   :  { %v685_v15 = vpop.f32.mrb[23].mxu0 }
 0x121   :  { %990 = vmatmul.mubr.bf16.gmra.mrb[20].mxu1 %v1072_v7 }
 0x1cc   :  { %v939_v16 = vpop.f32.mrb[0].mxu1 }
 0x1cd   :  { %v670_v18 = vadd.f32 %v939_v16, %v669_v11  ;;  %v457_v19 = vpop.f32.mrb[1].mxu1 }
 0x1ce   :  { %v667_v20 = vadd.f32 %v666_v9, %v457_v19 }
 0x1cf   :  { %v737_v21 = vadd.f32 %v1268_v17, %v670_v18 }
 0x1d0   :  { %v736_v22 = vadd.f32 %v1268_v17, %v667_v20  ;;  %v942_v23 = vpop.f32.mrb[2].mxu1 }
 0x1d1   :  { %753 = vst [vmem:[%s1339_s5 + $0x8] sm:$0xff] %v737_v21  ;;  %v678_v24 = vadd.f32 %v980_v10, %v942_v23  ;;  %v467_v25 = vpop.f32.mrb[3].mxu1 }
 0x1d2   :  { %752 = vst [vmem:[%s1339_s5] sm:$0xff] %v736_v22  ;;  %v675_v26 = vadd.f32 %v979_v8, %v467_v25 }
 0x1d3   :  { %v739_v27 = vadd.f32 %v1268_v17, %v678_v24 }
 0x1d4   :  { %v738_v28 = vadd.f32 %v1268_v17, %v675_v26  ;;  %v945_v29 = vpop.f32.mrb[4].mxu1 }
 0x1d5   :  { %755 = vst [vmem:[%s1339_s5 + $0x18] sm:$0xff] %v739_v27  ;;  %v686_v30 = vadd.f32 %v945_v29, %v685_v15  ;;  %v477_v31 = vpop.f32.mrb[5].mxu1 }
 0x1d6   :  { %754 = vst [vmem:[%s1339_s5 + $0x10] sm:$0xff] %v738_v28  ;;  %v683_v32 = vadd.f32 %v682_v13, %v477_v31 }
 0x1d7   :  { %v741_v33 = vadd.f32 %v1268_v17, %v686_v30 }
 0x1d8   :  { %v740_v34 = vadd.f32 %v1268_v17, %v683_v32  ;;  %v948_v35 = vpop.f32.mrb[6].mxu1 }
 0x1d9   :  { %757 = vst [vmem:[%s1339_s5 + $0x28] sm:$0xff] %v741_v33  ;;  %v694_v36 = vadd.f32 %v984_v14, %v948_v35  ;;  %v487_v37 = vpop.f32.mrb[7].mxu1 }
 0x1da   :  { %756 = vst [vmem:[%s1339_s5 + $0x20] sm:$0xff] %v740_v34  ;;  %v691_v38 = vadd.f32 %v983_v12, %v487_v37 }
 0x1db   :  { %v743_v39 = vadd.f32 %v1268_v17, %v694_v36 }
 0x1dc   :  { %v742_v40 = vadd.f32 %v1268_v17, %v691_v38  ;;  %v951_v41 = vpop.f32.mrb[8].mxu1 }
 0x1dd   :  { %759 = vst [vmem:[%s1339_s5 + $0x38] sm:$0xff] %v743_v39  ;;  %v497_v42 = vpop.f32.mrb[9].mxu1 }
 0x1de   :  { %758 = vst [vmem:[%s1339_s5 + $0x30] sm:$0xff] %v742_v40 }
 0x1e0   :  { %v954_v43 = vpop.f32.mrb[10].mxu1 }
 0x1e1   :  { %v507_v44 = vpop.f32.mrb[11].mxu1 }
 0x1e4   :  { %v957_v45 = vpop.f32.mrb[12].mxu1 }
 0x1e5   :  { %v517_v46 = vpop.f32.mrb[13].mxu1 }
 0x1e8   :  { %v960_v47 = vpop.f32.mrb[14].mxu1 }
 0x1e9   :  { %v527_v48 = vpop.f32.mrb[15].mxu1 }
 0x1ec   :  { %v987_v49 = vpop.f32.mrb[16].mxu1 }
 0x1ed   :  { %v707_v50 = vadd.f32 %v987_v49, %v507_v44  ;;  %v698_v51 = vpop.f32.mrb[17].mxu1 }
 0x1ee   :  { %v699_v52 = vadd.f32 %v698_v51, %v497_v42  ;;  %v988_v53 = vpop.f32.mrb[18].mxu1 }
 0x1ef   :  { %v746_v54 = vadd.f32 %v1268_v17, %v707_v50  ;;  %v710_v55 = vadd.f32 %v988_v53, %v954_v43  ;;  %v701_v56 = vpop.f32.mrb[19].mxu1 }
 0x1f0   :  { %v744_v57 = vadd.f32 %v1268_v17, %v699_v52  ;;  %v702_v58 = vadd.f32 %v951_v41, %v701_v56 }
 0x1f1   :  { %762 = vst [vmem:[%s1339_s5 + $0x50] sm:$0xff] %v746_v54  ;;  %v747_v59 = vadd.f32 %v1268_v17, %v710_v55 }
 0x1f2   :  { %760 = vst [vmem:[%s1339_s5 + $0x40] sm:$0xff] %v744_v57  ;;  %v745_v60 = vadd.f32 %v1268_v17, %v702_v58 }
 0x1f3   :  { %763 = vst [vmem:[%s1339_s5 + $0x58] sm:$0xff] %v747_v59 }
 0x1f4   :  { %761 = vst [vmem:[%s1339_s5 + $0x48] sm:$0xff] %v745_v60  ;;  %v991_v61 = vpop.f32.mrb[20].mxu1 }
 0x1f5   :  { %v723_v62 = vadd.f32 %v991_v61, %v527_v48  ;;  %v714_v63 = vpop.f32.mrb[21].mxu1 }
 0x1f6   :  { %v715_v0 = vadd.f32 %v714_v63, %v517_v46  ;;  %v992_v1 = vpop.f32.mrb[22].mxu1 }
 0x1f7   :  { %v750_v2 = vadd.f32 %v1268_v17, %v723_v62  ;;  %v726_v3 = vadd.f32 %v992_v1, %v960_v47  ;;  %v717_v4 = vpop.f32.mrb[23].mxu1 }
 0x1f8   :  { %v748_v5 = vadd.f32 %v1268_v17, %v715_v0  ;;  %v718_v6 = vadd.f32 %v957_v45, %v717_v4 }
 0x1f9   :  { %766 = vst [vmem:[%s1339_s5 + $0x70] sm:$0xff] %v750_v2  ;;  %v751_v7 = vadd.f32 %v1268_v17, %v726_v3 }
 0x1fa   :  { %764 = vst [vmem:[%s1339_s5 + $0x60] sm:$0xff] %v748_v5  ;;  %v749_v8 = vadd.f32 %v1268_v17, %v718_v6 }
 0x1fb   :  { %767 = vst [vmem:[%s1339_s5 + $0x78] sm:$0xff] %v751_v7 }
 0x1fc   :  { %765 = vst [vmem:[%s1339_s5 + $0x68] sm:$0xff] %v749_v8 }

</bundles_post_ra>
